<compile_context>
chip_gen: v7x
topology: tpu7x:2x2x1
jax: 0.10.0
libtpu: 0.0.40
codegen_flags: <defaults>
</compile_context>

<pallas_src>
import collections

import jax
import jax.numpy as jnp
import numpy as np
from jax.experimental import pallas as pl
from jax.experimental.pallas import tpu as pltpu

SingleTrackParamsList = [
    'm', 'g', 'I_z', 'L', 'lr', 'lf', 'Cd0', 'Cd1', 'Cd2', 'mu_static',
    'I_e', 'K_fi', 'b0', 'b1', 'R', 'tau_omega', 'tau_delta', 'eps',
]
SingleTrackParams = collections.namedtuple(
    'SingleTrackParams', SingleTrackParamsList,
    defaults=(None,) * len(SingleTrackParamsList))

NUM_IN = 16          # forward indexes p[..., 0] .. p[..., 15]
_TB_MAX = 16384      # lane-tile width (sweepable 16k-32k); blocks stay tiny in VMEM
_TC_SPLIT_MIN = 2048  # above this many lanes, force grid >= 2 (v7x dual-TC sharding)


def _round_up(x: int, m: int) -> int:
    return ((x + m - 1) // m) * m


def _lf_kernel(L_ref, lr_ref, lf_ref):
    # (1, tb) lane-dense blocks; one streaming VPU subtract, no tile binding.
    lf_ref[...] = L_ref[...] - lr_ref[...]


def _lf_pallas(L_row: jnp.ndarray, lr_row: jnp.ndarray, tb: int) -> jnp.ndarray:
    """L_row, lr_row: (1, B_pad) with B_pad a multiple of tb (tb mult. of 128)."""
    b_pad = L_row.shape[1]
    grid = (b_pad // tb,)
    return pl.pallas_call(
        _lf_kernel,
        out_shape=jax.ShapeDtypeStruct((1, b_pad), L_row.dtype),
        grid=grid,
        in_specs=[pl.BlockSpec((1, tb), lambda i: (0, i)),
                  pl.BlockSpec((1, tb), lambda i: (0, i))],
        out_specs=pl.BlockSpec((1, tb), lambda i: (0, i)),
        compiler_params=pltpu.CompilerParams(
            dimension_semantics=("parallel",)),
    )(L_row, lr_row)


class VehicleParameters:
    """JAX/Pallas port of the PyTorch VehicleParameters module."""

    def __init__(self, min_pallas_batch: int = 0) -> None:
        # Mirrors the PyTorch module (default_params_tensor has 10 columns,
        # even though forward() indexes 16 — kept faithful to the spec).
        self.param_count = self.default_params_tensor().shape[-1]
        # registered buffer eps, shape (1,), float32, non-trainable
        self.eps = jnp.asarray([1e-06], dtype=jnp.float32)
        # Set to e.g. 2048 to skip the Pallas launch for tiny batches where
        # fixed launch overhead dominates; 0 keeps the kernel path always on.
        self.min_pallas_batch = min_pallas_batch

    def __call__(self, p: jnp.ndarray) -> SingleTrackParams:
        return self.forward(p)

    def forward(self, p: jnp.ndarray) -> SingleTrackParams:
        if p.shape[-1] < NUM_IN:
            raise ValueError(
                f"expected last dim >= {NUM_IN}, got {p.shape[-1]}")
        lead_shape = p.shape[:-1]
        B = int(np.prod(lead_shape, dtype=np.int64)) if lead_shape else 1

        L = p[..., 3]
        lr = p[..., 4]

        if B == 0 or B < self.min_pallas_batch:
            # Degenerate / tiny batch: plain XLA subtract (no kernel launch).
            lf = L - lr
        else:
            # Lane-dense (1, B) rows for just the two columns the kernel needs.
            L_row = L.reshape(1, B)
            lr_row = lr.reshape(1, B)

            b128 = _round_up(B, 128)
            if b128 <= _TC_SPLIT_MIN:
                tb = b128                       # single block, no extra steps
            else:
                # >= 2 grid steps so ("parallel",) uses both TCs on v7x;
                # cap at _TB_MAX to amortize ~0.35us/step on huge batches.
                tb = min(_TB_MAX, _round_up(-(-b128 // 2), 128))
            b_pad = _round_up(B, tb)            # exact-divide grid, no ragged block
            if b_pad != B:
                L_row = jnp.pad(L_row, ((0, 0), (0, b_pad - B)))
                lr_row = jnp.pad(lr_row, ((0, 0), (0, b_pad - B)))

            lf = _lf_pallas(L_row, lr_row, tb)[0, :B].reshape(lead_shape)

        # All other fields are plain views/slices of the input, matching the
        # PyTorch module (no kernel pass-through copy).
        return SingleTrackParams(
            m=p[..., 0], g=p[..., 1], I_z=p[..., 2], L=L, lr=lr, lf=lf,
            Cd0=p[..., 5], Cd1=p[..., 6], Cd2=p[..., 7], mu_static=p[..., 8],
            I_e=p[..., 9], K_fi=p[..., 10], b0=p[..., 11], b1=p[..., 12],
            R=p[..., 13], tau_omega=p[..., 14], tau_delta=p[..., 15],
            eps=self.eps)

    @staticmethod
    def default_params_tensor(batch_size: int = 1) -> jnp.ndarray:
        base = jnp.asarray(
            [0.46, 0.115, 0.01, 0.01, 0.01, 0.2,
             0.90064745, 0.304115174, 0.50421894, 0.05],
            dtype=jnp.float32)
        return jnp.tile(base[None, :], (batch_size, 1))

    @staticmethod
    def get_params_names():
        return ['m', 'g', 'I_z', 'L', 'lr', 'lf', 'Cd0', 'Cd1', 'Cd2',
                'mu_static', 'I_e', 'K_fi', 'b0', 'b1', 'R']


if __name__ == "__main__":
    key = jax.random.PRNGKey(0)
    # Small batch, 16 parameter columns (forward indexes up to p[..., 15]).
    p = jax.random.uniform(key, (8, 16), dtype=jnp.float32)

    module = VehicleParameters()          # min_pallas_batch=0 -> Pallas path runs
    result = module(p)
    jax.block_until_ready(result.lf)

    # Reference check against plain numpy semantics.
    p_np = np.asarray(p)
    assert result.m.shape == (8,)
    assert result.lf.shape == (8,)
    assert result.eps.shape == (1,)
    np.testing.assert_allclose(np.asarray(result.m), p_np[:, 0], rtol=0, atol=0)
    np.testing.assert_allclose(np.asarray(result.g), p_np[:, 1], rtol=0, atol=0)
    np.testing.assert_allclose(np.asarray(result.I_z), p_np[:, 2], rtol=0, atol=0)
    np.testing.assert_allclose(np.asarray(result.L), p_np[:, 3], rtol=0, atol=0)
    np.testing.assert_allclose(np.asarray(result.lr), p_np[:, 4], rtol=0, atol=0)
    np.testing.assert_allclose(
        np.asarray(result.lf), p_np[:, 3] - p_np[:, 4], rtol=0, atol=0)
    np.testing.assert_allclose(np.asarray(result.Cd0), p_np[:, 5], rtol=0, atol=0)
    np.testing.assert_allclose(
        np.asarray(result.mu_static), p_np[:, 8], rtol=0, atol=0)
    np.testing.assert_allclose(np.asarray(result.R), p_np[:, 13], rtol=0, atol=0)
    np.testing.assert_allclose(
        np.asarray(result.tau_omega), p_np[:, 14], rtol=0, atol=0)
    np.testing.assert_allclose(
        np.asarray(result.tau_delta), p_np[:, 15], rtol=0, atol=0)
    np.testing.assert_allclose(
        np.asarray(result.eps), np.asarray([1e-06], np.float32))

    print("KERNEL_OK")
</pallas_src>

<mosaic_0001>
module attributes {stable_mosaic.version = 11 : i64} {
  func.func @_lf_kernel(%arg0: i32, %arg1: memref<1x128xf32, #tpu.memory_space<vmem>>, %arg2: memref<1x128xf32, #tpu.memory_space<vmem>>, %arg3: memref<1x128xf32, #tpu.memory_space<vmem>>) attributes {dimension_semantics = [#tpu.dimension_semantics<parallel>], iteration_bounds = array<i64: 1>, scalar_prefetch = 0 : i64, scratch_operands = 0 : i64, tpu.core_type = #tpu.core_type<tc>, window_params = [{transform_indices = @transform_0, window_bounds = array<i64: 1, 128>}, {transform_indices = @transform_1, window_bounds = array<i64: 1, 128>}, {transform_indices = @transform_2, window_bounds = array<i64: 1, 128>}]} {
    %c0 = arith.constant 0 : index
    %c0_0 = arith.constant 0 : index
    %0 = vector.load %arg1[%c0, %c0_0] : memref<1x128xf32, #tpu.memory_space<vmem>>, vector<1x128xf32>
    %c0_1 = arith.constant 0 : index
    %c0_2 = arith.constant 0 : index
    %1 = vector.load %arg2[%c0_1, %c0_2] : memref<1x128xf32, #tpu.memory_space<vmem>>, vector<1x128xf32>
    %2 = arith.subf %0, %1 : vector<1x128xf32>
    %c0_3 = arith.constant 0 : index
    %c0_4 = arith.constant 0 : index
    %3 = vector.load %arg3[%c0_3, %c0_4] : memref<1x128xf32, #tpu.memory_space<vmem>>, vector<1x128xf32>
    tpu.vector_store %arg3[%c0_3, %c0_4], %2 {strides = array<i32>} : memref<1x128xf32, #tpu.memory_space<vmem>>, vector<1x128xf32>,
    return
  }
  func.func @transform_0(%arg0: i32) -> (i32, i32) {
    %c0_i32 = arith.constant 0 : i32
    %c0_i32_0 = arith.constant 0 : i32
    return %c0_i32, %arg0 : i32, i32
  }
  func.func @transform_1(%arg0: i32) -> (i32, i32) {
    %c0_i32 = arith.constant 0 : i32
    %c0_i32_0 = arith.constant 0 : i32
    return %c0_i32, %arg0 : i32, i32
  }
  func.func @transform_2(%arg0: i32) -> (i32, i32) {
    %c0_i32 = arith.constant 0 : i32
    %c0_i32_0 = arith.constant 0 : i32
    return %c0_i32, %arg0 : i32, i32
  }
}

</mosaic_0001>

<bundles_post_ra>
// kernel: tpu_custom_call.1
= control target key start
LH: loop header
LB: loop body
LE: loop exit
PB: predicated region body
PF: predicated region fallthrough
CT: control target
= control target key end

     0   :  { %7 = vsyncpa [#allocation3], 0  ;;  %s137_s0 = inlined_call_operand.hbm [shape: f32[1,128], index: 0, kind: input, shape index: {}]   ;;  %s138_s1 = inlined_call_operand.vmem [shape: f32[1,128], index: 1, kind: input, shape index: {}]   ;;  %s139_s2 = inlined_call_operand.hbm [shape: f32[1,128], index: 2, kind: output, shape index: {}]  }
   0x1   :  { %8 = vsyncpa [#allocation4], 0  ;;  %s93_s9 = smov [#allocation2]   ;;  %s45_s13 = scalar_lea.hbm %s137_s0, 16 }
   0x2   :  { %s15_s10 = sshll.u32 %s93_s9, 4  ;;  %p46_p0 = scmp.ne.s32.totalorder %s137_s0, %s45_s13  ;;  %s16_s10 = int_to_ptr.vmem [resolvable:$true] %s15_s10 }
   0x3   :  { %p49_p1 = scmp.lt.u32.totalorder %s45_s13, %s137_s0 }
   0x5   :  { %p51_p2 = pnand %p49_p1, %p46_p0 }
   0x7   :  { %54 = shalt.err (!%p51_p2)
}
   0x8   :  { %s55_s18 = scalar_lea.vmem %s16_s10, 16  ;;  %s59_s19 = scalar_lea.vmem %s16_s10, 32 }
   0x9   :  { %p56_p3 = scmp.ne.s32.totalorder %s16_s10, %s55_s18  ;;  %p60_p4 = scmp.lt.s32.totalorder %s16_s10, %s16_s10 }
   0xa   :  { %p61_p5 = scmp.lt.s32.totalorder %s59_s19, %s55_s18 }
   0xc   :  { %p62_p6 = por %p61_p5, %p60_p4 }
   0xe   :  { %p63_p7 = pnand %p62_p6, %p56_p3 }
  0x10   :  { %66 = shalt.err (!%p63_p7)
}
  0x11   :  { %18 = dma.hbm_to_vmem [thread:$0]  %s137_s0, 16, %s16_s10, [#allocation3]  }
  0x12   :  { %89 = dma.done.wait [#allocation3], 16  }
  0x13   :  { %90 = vsyncadd [#allocation3], 4294967280  ;;  %s94_s22 = smov [#allocation5]   ;;  %v24_v0 = vld [vmem:[#allocation2] sm:$0x1] }
  0x14   :  { %s34_s23 = sshll.u32 %s94_s22, 4  ;;  %v25_v1 = vld [vmem:[%s138_s1] sm:$0x1]  ;;  %s35_s23 = int_to_ptr.vmem [resolvable:$true] %s34_s23 }
  0x15   :  { %v26_v2 = vsub.f32 %v24_v0, %v25_v1  ;;  %s67_s26 = scalar_lea.vmem %s35_s23, 16  ;;  %s71_s27 = scalar_lea.vmem %s35_s23, 32 }
  0x16   :  { %p68_p8 = scmp.ne.s32.totalorder %s35_s23, %s67_s26  ;;  %p72_p9 = scmp.lt.s32.totalorder %s35_s23, %s35_s23 }
  0x17   :  { %27 = vst [vmem:[#allocation5] sm:$0x1] %v26_v2  ;;  %p73_p10 = scmp.lt.s32.totalorder %s71_s27, %s67_s26 }
  0x19   :  { %p74_p11 = por %p73_p10, %p72_p9 }
  0x1b   :  { %p75_p12 = pnand %p74_p11, %p68_p8 }
  0x1d   :  { %78 = shalt.err (!%p75_p12)
}
  0x1e   :  { %s79_s29 = scalar_lea.hbm %s139_s2, 16 }
  0x1f   :  { %p80_p13 = scmp.ne.s32.totalorder %s139_s2, %s79_s29  ;;  %p83_p0 = scmp.lt.u32.totalorder %s79_s29, %s139_s2 }
  0x21   :  { %p85_p1 = pnand %p83_p0, %p80_p13 }
  0x23   :  { %88 = shalt.err (!%p85_p1)
}
  0x24   :  { %37 = dma.vmem_to_hbm [thread:$0]  %s35_s23, 16, %s139_s2, [#allocation4]  }
  0x25   :  { %91 = dma.done.wait [#allocation4], 16  }
  0x26   :  { %92 = vsyncadd [#allocation4], 4294967280 }
  0x27   :  { %41 = vsyncpa [#allocation3], 1 }
  0x28   :  { %42 = vsyncpa [#allocation4], 1 }

</bundles_post_ra>
